<compile_context>
chip_gen: v5e
topology: v5e:2x2
jax: 0.10.0
libtpu: 0.0.40
codegen_flags: <defaults>
</compile_context>

<pallas_src>
import functools
import math

import jax
import jax.numpy as jnp
from jax import lax
from jax.experimental import pallas as pl
from jax.experimental.pallas import tpu as pltpu


def bin_packing_critic_kernel(state_ref, w1_ref, b1_ref, w2_ref, b2_ref, out_ref,
                              *, inv_p, negative_slope):
    # state: (TB, P, F)  w1: (F, E) (row 0 zeroed)  b1: (1, 1, E)  w2: (1, E)  b2: (1, 1)
    x = state_ref[...]
    # Layer 1 on the MXU: (TB, P, F) @ (F, E) -> (TB, P, E).  The zero first row
    # of w1 makes this identical to state[..., 1:] @ W1.
    h = lax.dot_general(
        x, w1_ref[...],
        dimension_numbers=(((2,), (0,)), ((), ())),
        preferred_element_type=jnp.float32,
    )
    h = h + b1_ref[...]
    h = jnp.where(h > 0, h, negative_slope * h)          # LeakyReLU(0.01)

    # Layer 2 + mean, with the width-1 matmul folded away:
    #   mean_p(h_p @ w2 + b2) == (sum_p h_p) @ w2 / P + b2
    hsum = jnp.sum(h, axis=1)                            # (TB, E)   sublane reduce
    q = jnp.sum(hsum * w2_ref[...], axis=-1)             # (TB,)     VPU mul + lane reduce
    out_ref[...] = (q * inv_p)[None, :] + b2_ref[...]    # lane-dense (1, TB) store


def _choose_tile_b(batch, p, e):
    """Largest batch tile that keeps the per-step VMEM footprint modest."""
    p_pad = max(8, ((p + 7) // 8) * 8)
    e_pad = max(128, ((e + 127) // 128) * 128)
    # f32 bytes per batch row resident in VMEM: double-buffered input block
    # (feature dim lane-pads to 128) + layer-1 activation (P, E).
    bytes_per_row = (2 * p_pad * 128 + p_pad * e_pad) * 4
    budget = 8 * 1024 * 1024
    tb = max(8, budget // bytes_per_row)
    if tb >= batch:
        return batch                     # single block: out block == full array, always legal
    return max(128, (tb // 128) * 128)   # tiled: multiple of 128 so (1, tile_b) stores stay dense/legal


def bin_packing_critic_forward(state, w1, b1, w2, b2, *, tile_b=None):
    """state: (batch, problem_dim, 4) float32 -> (batch,) float32."""
    b, p, f = state.shape
    e = w1.shape[1]
    assert f == w1.shape[0] + 1, "state last dim must be in_features + 1"

    if tile_b is None:
        tile_b = _choose_tile_b(b, p, e)
    grid = (pl.cdiv(b, tile_b),)

    # Fuse the state[..., 1:] slice into the matmul: zero first row of W1.
    w1_pad = jnp.concatenate([jnp.zeros((1, e), w1.dtype), w1], axis=0)  # (F, E)

    kernel = functools.partial(
        bin_packing_critic_kernel, inv_p=1.0 / p, negative_slope=0.01)

    out = pl.pallas_call(
        kernel,
        out_shape=jax.ShapeDtypeStruct((1, b), jnp.float32),
        grid_spec=pltpu.PrefetchScalarGridSpec(
            num_scalar_prefetch=0,
            grid=grid,
            in_specs=[
                pl.BlockSpec((tile_b, p, f), lambda i: (i, 0, 0)),   # state tile
                pl.BlockSpec((f, e), lambda i: (0, 0)),              # W1 (resident)
                pl.BlockSpec((1, 1, e), lambda i: (0, 0, 0)),        # b1
                pl.BlockSpec((1, e), lambda i: (0, 0)),              # w2 row
                pl.BlockSpec((1, 1), lambda i: (0, 0)),              # b2
            ],
            out_specs=pl.BlockSpec((1, tile_b), lambda i: (0, i)),
        ),
        compiler_params=pltpu.CompilerParams(
            dimension_semantics=("parallel",),
            vmem_limit_bytes=32 * 1024 * 1024,
        ),
    )(
        state.astype(jnp.float32),
        w1_pad,
        b1.reshape(1, 1, e),
        w2.reshape(1, e),
        b2.reshape(1, 1),
    )
    # TODO(synk): optionally accept bf16 state/weights to halve HBM traffic on a
    # bandwidth-bound kernel (kept f32 here to match the PyTorch module exactly).
    return out[0]


def init_params(key, embed_dim):
    """Xavier-uniform weights (as in the PyTorch module), biases = 0.01."""
    k1, k2 = jax.random.split(key)
    bound1 = math.sqrt(6.0 / (3 + embed_dim))
    w1 = jax.random.uniform(k1, (3, embed_dim), jnp.float32, -bound1, bound1)
    b1 = jnp.full((embed_dim,), 0.01, jnp.float32)
    bound2 = math.sqrt(6.0 / (embed_dim + 1))
    w2 = jax.random.uniform(k2, (embed_dim, 1), jnp.float32, -bound2, bound2)
    b2 = jnp.full((1,), 0.01, jnp.float32)
    return w1, b1, w2, b2


def reference_forward(state, w1, b1, w2, b2):
    """Pure-JAX reference of the PyTorch module, for validation."""
    feat = state[..., 1:]
    h = feat @ w1 + b1
    h = jnp.where(h > 0, h, 0.01 * h)                    # LeakyReLU(0.01)
    q = (h @ w2 + b2)[..., 0]                            # (B, P)
    return q.mean(axis=-1)


if __name__ == "__main__":
    n_problems, problem_dim, embed_dim = 8, 16, 128

    key = jax.random.PRNGKey(0)
    k_params, k_state = jax.random.split(key)

    w1, b1, w2, b2 = init_params(k_params, embed_dim)

    # Deterministic bin-packing state: [item id/assignment, 3 features].
    state = jax.random.uniform(
        k_state, (n_problems, problem_dim, 4), jnp.float32)

    out = bin_packing_critic_forward(state, w1, b1, w2, b2)
    out = jax.block_until_ready(out)

    ref = reference_forward(state, w1, b1, w2, b2)
    assert out.shape == (n_problems,)
    assert jnp.allclose(out, ref, atol=1e-4, rtol=1e-4), (out, ref)

    print("KERNEL_OK")
</pallas_src>

<mosaic_0001>
module attributes {stable_mosaic.version = 11 : i64} {
  func.func @bin_packing_critic_kernel(%arg0: i32, %arg1: memref<8x16x4xf32, #tpu.memory_space<vmem>>, %arg2: memref<4x128xf32, #tpu.memory_space<vmem>>, %arg3: memref<1x1x128xf32, #tpu.memory_space<vmem>>, %arg4: memref<1x128xf32, #tpu.memory_space<vmem>>, %arg5: memref<1x1xf32, #tpu.memory_space<vmem>>, %arg6: memref<1x8xf32, #tpu.memory_space<vmem>>) attributes {dimension_semantics = [#tpu.dimension_semantics<parallel>], iteration_bounds = array<i64: 1>, scalar_prefetch = 0 : i64, scratch_operands = 0 : i64, tpu.core_type = #tpu.core_type<tc>, window_params = [{transform_indices = @transform_0, window_bounds = array<i64: 8, 16, 4>}, {pipeline_mode = #tpu.pipeline_mode<synchronous>, transform_indices = @transform_1, window_bounds = array<i64: 4, 128>}, {pipeline_mode = #tpu.pipeline_mode<synchronous>, transform_indices = @transform_2, window_bounds = array<i64: 1, 1, 128>}, {pipeline_mode = #tpu.pipeline_mode<synchronous>, transform_indices = @transform_3, window_bounds = array<i64: 1, 128>}, {pipeline_mode = #tpu.pipeline_mode<synchronous>, transform_indices = @transform_4, window_bounds = array<i64: 1, 1>}, {transform_indices = @transform_5, window_bounds = array<i64: 1, 8>}]} {
    %c0 = arith.constant 0 : index
    %c0_0 = arith.constant 0 : index
    %c0_1 = arith.constant 0 : index
    %0 = vector.load %arg1[%c0, %c0_0, %c0_1] : memref<8x16x4xf32, #tpu.memory_space<vmem>>, vector<8x16x4xf32>
    %c0_2 = arith.constant 0 : index
    %c0_3 = arith.constant 0 : index
    %1 = vector.load %arg2[%c0_2, %c0_3] : memref<4x128xf32, #tpu.memory_space<vmem>>, vector<4x128xf32>
    %cst = arith.constant dense<0.000000e+00> : vector<8x16x128xf32>
    %2 = tpu.matmul %0, %1, %cst {dimension_numbers = #tpu.dot_dimension_numbers<[2], [0], [0, 1], [1], [0, 0, 0, 1, 1, 1], [], []>} : vector<8x16x4xf32>, vector<4x128xf32>, vector<8x16x128xf32> -> vector<8x16x128xf32>
    %c0_4 = arith.constant 0 : index
    %c0_5 = arith.constant 0 : index
    %c0_6 = arith.constant 0 : index
    %3 = vector.load %arg3[%c0_4, %c0_5, %c0_6] : memref<1x1x128xf32, #tpu.memory_space<vmem>>, vector<1x1x128xf32>
    %4 = vector.broadcast %3 : vector<1x1x128xf32> to vector<8x16x128xf32>
    %5 = arith.addf %2, %4 : vector<8x16x128xf32>
    %cst_7 = arith.constant 0.000000e+00 : f32
    %6 = vector.broadcast %cst_7 : f32 to vector<8x16x128xf32>
    %7 = arith.cmpf ogt, %5, %6 : vector<8x16x128xf32>
    %cst_8 = arith.constant 0.00999999977 : f32
    %8 = vector.broadcast %cst_8 : f32 to vector<8x16x128xf32>
    %9 = arith.mulf %8, %5 : vector<8x16x128xf32>
    %10 = arith.select %7, %5, %9 : vector<8x16x128xi1>, vector<8x16x128xf32>
    %cst_9 = arith.constant dense<0.000000e+00> : vector<8x128xf32>
    %11 = vector.multi_reduction <add>, %10, %cst_9 [1] : vector<8x16x128xf32> to vector<8x128xf32>
    %c0_10 = arith.constant 0 : index
    %c0_11 = arith.constant 0 : index
    %12 = vector.load %arg4[%c0_10, %c0_11] : memref<1x128xf32, #tpu.memory_space<vmem>>, vector<1x128xf32>
    %13 = vector.broadcast %12 : vector<1x128xf32> to vector<8x128xf32>
    %14 = arith.mulf %11, %13 : vector<8x128xf32>
    %cst_12 = arith.constant dense<0.000000e+00> : vector<8xf32>
    %15 = vector.multi_reduction <add>, %14, %cst_12 [1] : vector<8x128xf32> to vector<8xf32>
    %cst_13 = arith.constant 6.250000e-02 : f32
    %16 = vector.broadcast %cst_13 : f32 to vector<8xf32>
    %17 = arith.mulf %15, %16 : vector<8xf32>
    %18 = vector.shape_cast %17 : vector<8xf32> to vector<1x8xf32>
    %c0_14 = arith.constant 0 : index
    %c0_15 = arith.constant 0 : index
    %19 = vector.load %arg5[%c0_14, %c0_15] : memref<1x1xf32, #tpu.memory_space<vmem>>, vector<1x1xf32>
    %20 = vector.broadcast %19 : vector<1x1xf32> to vector<1x8xf32>
    %21 = arith.addf %18, %20 : vector<1x8xf32>
    %c0_16 = arith.constant 0 : index
    %c0_17 = arith.constant 0 : index
    %22 = vector.load %arg6[%c0_16, %c0_17] : memref<1x8xf32, #tpu.memory_space<vmem>>, vector<1x8xf32>
    tpu.vector_store %arg6[%c0_16, %c0_17], %21 {strides = array<i32>} : memref<1x8xf32, #tpu.memory_space<vmem>>, vector<1x8xf32>,
    return
  }
  func.func @transform_0(%arg0: i32) -> (i32, i32, i32) {
    %c0_i32 = arith.constant 0 : i32
    %c0_i32_0 = arith.constant 0 : i32
    %c0_i32_1 = arith.constant 0 : i32
    return %arg0, %c0_i32, %c0_i32_0 : i32, i32, i32
  }
  func.func @transform_1(%arg0: i32) -> (i32, i32) {
    %c0_i32 = arith.constant 0 : i32
    %c0_i32_0 = arith.constant 0 : i32
    %c0_i32_1 = arith.constant 0 : i32
    return %c0_i32, %c0_i32_0 : i32, i32
  }
  func.func @transform_2(%arg0: i32) -> (i32, i32, i32) {
    %c0_i32 = arith.constant 0 : i32
    %c0_i32_0 = arith.constant 0 : i32
    %c0_i32_1 = arith.constant 0 : i32
    %c0_i32_2 = arith.constant 0 : i32
    return %c0_i32, %c0_i32_0, %c0_i32_1 : i32, i32, i32
  }
  func.func @transform_3(%arg0: i32) -> (i32, i32) {
    %c0_i32 = arith.constant 0 : i32
    %c0_i32_0 = arith.constant 0 : i32
    %c0_i32_1 = arith.constant 0 : i32
    return %c0_i32, %c0_i32_0 : i32, i32
  }
  func.func @transform_4(%arg0: i32) -> (i32, i32) {
    %c0_i32 = arith.constant 0 : i32
    %c0_i32_0 = arith.constant 0 : i32
    %c0_i32_1 = arith.constant 0 : i32
    return %c0_i32, %c0_i32_0 : i32, i32
  }
  func.func @transform_5(%arg0: i32) -> (i32, i32) {
    %c0_i32 = arith.constant 0 : i32
    %c0_i32_0 = arith.constant 0 : i32
    return %c0_i32, %arg0 : i32, i32
  }
}

</mosaic_0001>

<bundles_post_ra>
// kernel: tpu_custom_call.1
= control target key start
LH: loop header
LB: loop body
LE: loop exit
PB: predicated region body
PF: predicated region fallthrough
CT: control target
= control target key end

     0   :  { %s523_s0 = inlined_call_operand.vmem [shape: f32[8,16,4], index: 0, kind: input, shape index: {}]   ;;  %s524_s1 = inlined_call_operand.vmem [shape: f32[4,128], index: 1, kind: input, shape index: {}]   ;;  %s525_s2 = inlined_call_operand.vmem [shape: f32[1,1,128], index: 2, kind: input, shape index: {}]   ;;  %s526_s3 = inlined_call_operand.vmem [shape: f32[1,128], index: 3, kind: input, shape index: {}]   ;;  %s527_s4 = inlined_call_operand.<no memory space> [shape: f32[1,1], index: 4, kind: input, shape index: {}]   ;;  %s528_s5 = inlined_call_operand.hbm [shape: f32[1,8], index: 5, kind: output, shape index: {}]  }
   0x1   :  { %v10_v0 = vstv %s527_s4 }
   0x2   :  { %11 = vst [vmem:[#allocation2] sm:$0x1] %v10_v0 }
   0x3   :  { %v39_v1 = vld [vmem:[%s524_s1] sm:$0xf]  ;;  %vm93_vm0 = vcmask 1043456   ;;  %vm44_vm1 = vcmask 31744  }
   0x4   :  { %v23_v2 = vld [vmem:[%s523_s0] sm:$0xff]  ;;  %342 = vmatpush.msk.msra.mxu0 %vm93_vm0, %v39_v1  ;;  %359 = vmatpush.msk.msra.mxu1 %vm93_vm0, %v39_v1 }
   0x5   :  { %v27_v3 = vld [vmem:[%s523_s0 + $0x20] sm:$0xff]  ;;  %360 = vmatpush.msk.msra.mxu2 %vm93_vm0, %v39_v1  ;;  %361 = vmatpush.msk.msra.mxu3 %vm93_vm0, %v39_v1 }
   0x6   :  { %v31_v4 = vld [vmem:[%s523_s0 + $0x40] sm:$0xff]  ;;  %343 = vmatmul.msk.f32.vlgmr.msra.gmra.mxu0 %vm44_vm1, %v23_v2  ;;  %347 = vmatmul.msk.f32.vlgmr.msra.gmra.mxu1 %vm44_vm1, %v27_v3 }
   0x7   :  { %v35_v5 = vld [vmem:[%s523_s0 + $0x60] sm:$0xff]  ;;  %351 = vmatmul.msk.f32.vlgmr.msra.gmra.mxu2 %vm44_vm1, %v31_v4 }
   0x8   :  { %355 = vmatmul.msk.f32.vlgmr.msra.gmra.mxu3 %vm44_vm1, %v35_v5 }
   0x9   :  { %12 = vsyncpa [#allocation4], 0  ;;  %v24_v6 = vld [vmem:[%s523_s0 + $0x8] sm:$0xff]  ;;  %v25_v10 = vld [vmem:[%s523_s0 + $0x10] sm:$0xff]  ;;  %s333_s30 = sshll.u32 %s528_s5, 4  ;;  %s334_s30 = int_to_ptr.hbm [resolvable:$true] %s333_s30 }
   0xa   :  { %v28_v7 = vld [vmem:[%s523_s0 + $0x28] sm:$0xff]  ;;  %v29_v11 = vld [vmem:[%s523_s0 + $0x30] sm:$0xff]  ;;  %v26_v14 = vld [vmem:[%s523_s0 + $0x18] sm:$0xff] }
   0xb   :  { %v32_v8 = vld [vmem:[%s523_s0 + $0x48] sm:$0xff]  ;;  %v33_v12 = vld [vmem:[%s523_s0 + $0x50] sm:$0xff]  ;;  %v30_v15 = vld [vmem:[%s523_s0 + $0x38] sm:$0xff] }
   0xc   :  { %v36_v9 = vld [vmem:[%s523_s0 + $0x68] sm:$0xff]  ;;  %v37_v13 = vld [vmem:[%s523_s0 + $0x70] sm:$0xff]  ;;  %v34_v16 = vld [vmem:[%s523_s0 + $0x58] sm:$0xff] }
   0xd   :  { %v38_v17 = vld [vmem:[%s523_s0 + $0x78] sm:$0xff]  ;;  %v498_v18 = vld [vmem:[%s525_s2] ss:$0 sm:$0xff] }
   0xe   :  { %344 = vmatmul.msk.f32.gmra.mxu0 %vm44_vm1, %v24_v6  ;;  %348 = vmatmul.msk.f32.gmra.mxu1 %vm44_vm1, %v28_v7 }
   0xf   :  { %352 = vmatmul.msk.f32.gmra.mxu2 %vm44_vm1, %v32_v8 }
  0x10   :  { %356 = vmatmul.msk.f32.gmra.mxu3 %vm44_vm1, %v36_v9 }
  0x16   :  { %345 = vmatmul.msk.f32.gmra.mxu0 %vm44_vm1, %v25_v10  ;;  %349 = vmatmul.msk.f32.gmra.mxu1 %vm44_vm1, %v29_v11 }
  0x17   :  { %353 = vmatmul.msk.f32.gmra.mxu2 %vm44_vm1, %v33_v12 }
  0x18   :  { %357 = vmatmul.msk.f32.gmra.mxu3 %vm44_vm1, %v37_v13 }
  0x1e   :  { %346 = vmatmul.msk.f32.gmra.mxu0 %vm44_vm1, %v26_v14  ;;  %350 = vmatmul.msk.f32.gmra.mxu1 %vm44_vm1, %v30_v15 }
  0x1f   :  { %354 = vmatmul.msk.f32.gmra.mxu2 %vm44_vm1, %v34_v16 }
  0x20   :  { %358 = vmatmul.msk.f32.gmra.mxu3 %vm44_vm1, %v38_v17 }
  0x83   :  { %v114_v19 = vpop.f32.mrf.mxu0  ;;  %v126_v20 = vpop.f32.mrf.mxu1 }
  0x84   :  { %v115_v21 = vadd.f32 %v498_v18, %v114_v19  ;;  %v127_v22 = vadd.f32 %v498_v18, %v126_v20 }
  0x86   :  { %v178_v25 = vmul.f32 0.01, %v115_v21  ;;  %vm162_vm2 = vcmp.gt.f32.partialorder %v115_v21, 0.0  ;;  %v182_v28 = vmul.f32 0.01, %v127_v22  ;;  %vm166_vm3 = vcmp.gt.f32.partialorder %v127_v22, 0.0 }
  0x88   :  { %v194_v33 = vsel %vm162_vm2, %v115_v21, %v178_v25  ;;  %v198_v35 = vsel %vm166_vm3, %v127_v22, %v182_v28  ;;  %vm287_vm2 = vcmask 1041409   ;;  %vm290_vm3 = vcmask 1042434  }
  0x8a   :  { %v138_v23 = vpop.f32.mrf.mxu2 }
  0x8b   :  { %v150_v24 = vpop.f32.mrf.mxu3  ;;  %v117_v26 = vpop.f32.mrf.mxu0  ;;  %v139_v34 = vadd.f32 %v498_v18, %v138_v23 }
  0x8c   :  { %v129_v27 = vpop.f32.mrf.mxu1  ;;  %v118_v29 = vadd.f32 %v498_v18, %v117_v26  ;;  %v151_v36 = vadd.f32 %v498_v18, %v150_v24 }
  0x8d   :  { %v130_v30 = vadd.f32 %v498_v18, %v129_v27  ;;  %v186_v43 = vmul.f32 0.01, %v139_v34  ;;  %vm170_vm6 = vcmp.gt.f32.partialorder %v139_v34, 0.0 }
  0x8e   :  { %vm163_vm4 = vcmp.gt.f32.partialorder %v118_v29, 0.0  ;;  %v179_v31 = vmul.f32 0.01, %v118_v29  ;;  %v190_v48 = vmul.f32 0.01, %v151_v36  ;;  %vm174_vm7 = vcmp.gt.f32.partialorder %v151_v36, 0.0 }
  0x8f   :  { %vm167_vm5 = vcmp.gt.f32.partialorder %v130_v30, 0.0  ;;  %v183_v32 = vmul.f32 0.01, %v130_v30  ;;  %v202_v53 = vsel %vm170_vm6, %v139_v34, %v186_v43  ;;  %vm299_vm6 = vcmask 1045509  }
  0x90   :  { %v195_v37 = vsel %vm163_vm4, %v118_v29, %v179_v31  ;;  %v206_v56 = vsel %vm174_vm7, %v151_v36, %v190_v48  ;;  %vm293_vm4 = vcmask 1043459   ;;  %vm302_vm7 = vcmask 1046534  }
  0x91   :  { %v199_v38 = vsel %vm167_vm5, %v130_v30, %v183_v32  ;;  %v210_v39 = vadd.f32 %v195_v37, %v194_v33  ;;  %vm296_vm5 = vcmask 1044484  }
  0x92   :  { %v224_v40 = vadd.f32 %v199_v38, %v198_v35  ;;  %v141_v41 = vpop.f32.mrf.mxu2 }
  0x93   :  { %v153_v42 = vpop.f32.mrf.mxu3  ;;  %v142_v44 = vadd.f32 %v498_v18, %v141_v41  ;;  %v120_v46 = vpop.f32.mrf.mxu0  ;;  %v211_v49 = vrot.slane %v210_v39, 4 }
  0x94   :  { %v154_v45 = vadd.f32 %v498_v18, %v153_v42  ;;  %v132_v47 = vpop.f32.mrf.mxu1  ;;  %v225_v50 = vrot.slane %v224_v40, 4  ;;  %v121_v55 = vadd.f32 %v498_v18, %v120_v46  ;;  %v393_v46 = vmov 0  }
  0x95   :  { %vm171_vm8 = vcmp.gt.f32.partialorder %v142_v44, 0.0  ;;  %v187_v51 = vmul.f32 0.01, %v142_v44  ;;  %v212_v57 = vadd.f32 %v211_v49, %v210_v39  ;;  %v133_v62 = vadd.f32 %v498_v18, %v132_v47  ;;  %364 = vset.pattern.permute.xlu0 %v393_v46 }
  0x96   :  { %vm175_vm9 = vcmp.gt.f32.partialorder %v154_v45, 0.0  ;;  %v191_v52 = vmul.f32 0.01, %v154_v45  ;;  %v226_v60 = vadd.f32 %v225_v50, %v224_v40  ;;  %v180_v2 = vmul.f32 0.01, %v121_v55 }
  0x97   :  { %v203_v54 = vsel %vm171_vm8, %v142_v44, %v187_v51  ;;  %v213_v5 = vrot.slane %v212_v57, 2  ;;  %vm164_vm10 = vcmp.gt.f32.partialorder %v121_v55, 0.0  ;;  %v184_v9 = vmul.f32 0.01, %v133_v62 }
  0x98   :  { %v238_v58 = vadd.f32 %v203_v54, %v202_v53  ;;  %v207_v59 = vsel %vm175_vm9, %v154_v45, %v191_v52  ;;  %v227_v8 = vrot.slane %v226_v60, 2  ;;  %vm168_vm11 = vcmp.gt.f32.partialorder %v133_v62, 0.0 }
  0x99   :  { %v252_v61 = vadd.f32 %v207_v59, %v206_v56  ;;  %v196_v13 = vsel %vm164_vm10, %v121_v55, %v180_v2  ;;  %v214_v14 = vadd.f32 %v213_v5, %v212_v57  ;;  %v200_v20 = vsel %vm168_vm11, %v133_v62, %v184_v9  ;;  %v366_v56 = vld [vmem:[%s526_s3] ss:$0 sm:$0xff]  ;;  %s394_s3 = smov [#allocation3]  }
  0x9a   :  { %v239_v63 = vrot.slane %v238_v58, 4  ;;  %v144_v0 = vpop.f32.mrf.mxu2  ;;  %v228_v19 = vadd.f32 %v227_v8, %v226_v60  ;;  %vm305_vm8 = vcmask 1047559   ;;  %s331_s28 = sshll.u32 %s394_s3, 4  ;;  %vm324_vm9 = vcmask 57344   ;;  %s332_s28 = int_to_ptr.vmem [resolvable:$true] %s331_s28 }
  0x9b   :  { %v156_v1 = vpop.f32.mrf.mxu3  ;;  %v123_v3 = vpop.f32.mrf.mxu0  ;;  %v253_v6 = vrot.slane %v252_v61, 4  ;;  %v145_v12 = vadd.f32 %v498_v18, %v144_v0  ;;  %v215_v52 = vrot.slane %v214_v14, 1 }
  0x9c   :  { %v135_v4 = vpop.f32.mrf.mxu1  ;;  %v124_v7 = vadd.f32 %v498_v18, %v123_v3  ;;  %v240_v11 = vadd.f32 %v239_v63, %v238_v58  ;;  %v157_v16 = vadd.f32 %v498_v18, %v156_v1  ;;  %v229_v36 = vrot.slane %v228_v19, 1 }
  0x9d   :  { %v136_v10 = vadd.f32 %v498_v18, %v135_v4  ;;  %v254_v15 = vadd.f32 %v253_v6, %v252_v61  ;;  %vm172_vm14 = vcmp.gt.f32.partialorder %v145_v12, 0.0  ;;  %v188_v23 = vmul.f32 0.01, %v145_v12 }
  0x9e   :  { %vm165_vm12 = vcmp.gt.f32.partialorder %v124_v7, 0.0  ;;  %v181_v17 = vmul.f32 0.01, %v124_v7  ;;  %v241_v22 = vrot.slane %v240_v11, 2  ;;  %vm176_vm15 = vcmp.gt.f32.partialorder %v157_v16, 0.0 }
  0x9f   :  { %vm169_vm13 = vcmp.gt.f32.partialorder %v136_v10, 0.0  ;;  %v185_v21 = vmul.f32 0.01, %v136_v10  ;;  %v255_v31 = vrot.slane %v254_v15, 2  ;;  %v192_v32 = vmul.f32 0.01, %v157_v16 }
  0xa0   :  { %v197_v24 = vsel %vm165_vm12, %v124_v7, %v181_v17  ;;  %v242_v37 = vadd.f32 %v241_v22, %v240_v11  ;;  %v204_v40 = vsel %vm172_vm14, %v145_v12, %v188_v23  ;;  %v230_v57 = vadd.f32 %v229_v36, %v228_v19  ;;  %v311_v36 = vld [vmem:[#allocation2] sm:$0x1] }
  0xa1   :  { %v217_v27 = vadd.f32 %v197_v24, %v196_v13  ;;  %v201_v28 = vsel %vm169_vm13, %v136_v10, %v185_v21  ;;  %v208_v43 = vsel %vm176_vm15, %v157_v16, %v192_v32  ;;  %v256_v47 = vadd.f32 %v255_v31, %v254_v15 }
  0xa2   :  { %v147_v25 = vpop.f32.mrf.mxu2  ;;  %v231_v33 = vadd.f32 %v201_v28, %v200_v20  ;;  %v243_v53 = vrot.slane %v242_v37, 1  ;;  %v216_v1 = vadd.f32 %v215_v52, %v214_v14  ;;  %v272_v5 = vmul.f32 %v366_v56, %v230_v57 }
  0xa3   :  { %v159_v26 = vpop.f32.mrf.mxu3  ;;  %v148_v29 = vadd.f32 %v498_v18, %v147_v25  ;;  %v218_v34 = vrot.slane %v217_v27, 4  ;;  %v257_v62 = vrot.slane %v256_v47, 1 }
  0xa4   :  { %v160_v30 = vadd.f32 %v498_v18, %v159_v26  ;;  %v232_v38 = vrot.slane %v231_v33, 4  ;;  %v244_v2 = vadd.f32 %v243_v53, %v242_v37  ;;  %v270_v13 = vmul.f32 %v366_v56, %v216_v1 }
  0xa5   :  { %vm173_vm0 = vcmp.gt.f32.partialorder %v148_v29, 0.0  ;;  %v189_v35 = vmul.f32 0.01, %v148_v29  ;;  %v219_v41 = vadd.f32 %v218_v34, %v217_v27  ;;  %v258_v9 = vadd.f32 %v257_v62, %v256_v47 }
  0xa6   :  { %vm177_vm1 = vcmp.gt.f32.partialorder %v160_v30, 0.0  ;;  %v193_v39 = vmul.f32 0.01, %v160_v30  ;;  %v233_v44 = vadd.f32 %v232_v38, %v231_v33  ;;  %v274_v17 = vmul.f32 %v366_v56, %v244_v2 }
  0xa7   :  { %v205_v42 = vsel %vm173_vm0, %v148_v29, %v189_v35  ;;  %v220_v48 = vrot.slane %v219_v41, 2  ;;  %v289_v19 = vrot.slane %v272_v5, 6  ;;  %v276_v21 = vmul.f32 %v366_v56, %v258_v9 }
  0xa8   :  { %v245_v45 = vadd.f32 %v205_v42, %v204_v40  ;;  %v209_v18 = vsel %vm177_vm1, %v160_v30, %v193_v39  ;;  %v234_v50 = vrot.slane %v233_v44, 2  ;;  %v295_v28 = vrot.slane %v274_v17, 4 }
  0xa9   :  { %v259_v49 = vadd.f32 %v209_v18, %v208_v43  ;;  %v221_v54 = vadd.f32 %v220_v48, %v219_v41  ;;  %v301_v31 = vrot.slane %v276_v21, 2  ;;  %v320_v38 = vlaneseq }
  0xaa   :  { %v246_v51 = vrot.slane %v245_v45, 4  ;;  %v235_v58 = vadd.f32 %v234_v50, %v233_v44 }
  0xab   :  { %v260_v55 = vrot.slane %v259_v49, 4  ;;  %v222_v60 = vrot.slane %v221_v54, 1  ;;  %v321_v41 = vand.u32 127, %v320_v38 }
  0xac   :  { %v247_v59 = vadd.f32 %v246_v51, %v245_v45  ;;  %v236_v63 = vrot.slane %v235_v58, 1 }
  0xad   :  { %v261_v61 = vadd.f32 %v260_v55, %v259_v49  ;;  %v223_v3 = vadd.f32 %v222_v60, %v221_v54 }
  0xae   :  { %v248_v0 = vrot.slane %v247_v59, 2  ;;  %v237_v6 = vadd.f32 %v236_v63, %v235_v58 }
  0xaf   :  { %v262_v4 = vrot.slane %v261_v61, 2  ;;  %v271_v8 = vmul.f32 %v366_v56, %v223_v3 }
  0xb0   :  { %v249_v7 = vadd.f32 %v248_v0, %v247_v59  ;;  %v273_v12 = vmul.f32 %v366_v56, %v237_v6 }
  0xb1   :  { %v263_v10 = vadd.f32 %v262_v4, %v261_v61  ;;  %v286_v15 = vrot.slane %v271_v8, 7 }
  0xb2   :  { %v250_v11 = vrot.slane %v249_v7, 1  ;;  %v292_v23 = vrot.slane %v273_v12, 5 }
  0xb3   :  { %v264_v16 = vrot.slane %v263_v10, 1  ;;  %v288_v22 = vsel %vm287_vm2, %v286_v15, %v270_v13 }
  0xb4   :  { %v251_v20 = vadd.f32 %v250_v11, %v249_v7  ;;  %v291_v25 = vsel %vm290_vm3, %v289_v19, %v288_v22 }
  0xb5   :  { %v265_v14 = vadd.f32 %v264_v16, %v263_v10  ;;  %v294_v27 = vsel %vm293_vm4, %v292_v23, %v291_v25 }
  0xb6   :  { %v275_v24 = vmul.f32 %v366_v56, %v251_v20  ;;  %v297_v30 = vsel %vm296_vm5, %v295_v28, %v294_v27 }
  0xb7   :  { %v277_v26 = vmul.f32 %v366_v56, %v265_v14 }
  0xb8   :  { %v298_v29 = vrot.slane %v275_v24, 3 }
  0xb9   :  { %v304_v33 = vrot.slane %v277_v26, 1 }
  0xba   :  { %v300_v32 = vsel %vm299_vm6, %v298_v29, %v297_v30 }
  0xbb   :  { %v303_v34 = vsel %vm302_vm7, %v301_v31, %v300_v32 }
  0xbc   :  { %v306_v35 = vsel %vm305_vm8, %v304_v33, %v303_v34 }
  0xbd   :  { %308 = vadd.xlane.f32.xlu0 %v306_v35 }
  0xd1   :  { %314 = vperm.xlu0 %364, %v311_v36  }
 0x130   :  { %v309_v37 = vpop.xlane.xlu0 %308 }
 0x131   :  { %v310_v40 = vmul.f32 0.0625, %v309_v37 }
 0x143   :  { %v315_v39 = vpop.permute.xlu0 %314 }
 0x144   :  { %v317_v42 = vperm.slane %v315_v39, 0 }
 0x146   :  { %v318_v43 = vadd.f32 %v317_v42, %v310_v40 }
 0x148   :  { %v322_v44 = vperm.slane %v318_v43, %v321_v41 }
 0x14a   :  { %325 = vst.msk [vmem:[#allocation3] sm:$0x1] %vm324_vm9, %v322_v44 }
 0x14b   :  { %336 = dma.vmem_to_hbm [thread:$0]  %s332_s28, 16, %s334_s30, [#allocation4]  }
 0x14c   :  { %391 = dma.done.wait [#allocation4], 16  }
 0x14d   :  { %392 = vsyncadd [#allocation4], 4294967280 }
 0x14e   :  { %341 = vsyncpa [#allocation4], 1 }

</bundles_post_ra>
